<compile_context>
chip_gen: v6e
topology: v6e:2x2x1
jax: 0.10.0
libtpu: 0.0.40
codegen_flags: <defaults>
</compile_context>

<pallas_src>
import functools

import jax
import jax.numpy as jnp
from jax.experimental import pallas as pl
from jax.experimental.pallas import tpu as pltpu

LANE = 128          # TPU lane width
SUBLANE = 8         # f32 sublane tile
_ACT_DTYPE = jnp.bfloat16                 # inter-layer activation storage / MXU operands
_CONV_VMEM_LIMIT = 48 * 1024 * 1024       # safe on v5e/v6e (128 MiB) and v7x (64 MiB)
_CONV_TILE_BUDGET = 16 * 1024 * 1024      # budget for the row-tiled buffers (excl. weights)


def _round_up(v, m):
    return ((v + m - 1) // m) * m


def _pick_tile(total, cap, quantum=1):
    """Largest divisor of `total` that is <= cap and quantum-aligned (or the full dim)."""
    if total <= cap:
        return total
    for d in range(min(cap, total), 0, -1):
        if total % d == 0 and d % quantum == 0:
            return d
    return total


# --------------------------------------------------------------------------- #
# criterion: fused |x - gt| (or (x - gt)^2) full reduction
# --------------------------------------------------------------------------- #
def _make_reduce_kernel(square, valid_rows, block_r, inner_b):
    def kernel(x_ref, g_ref, acc_ref):
        i = pl.program_id(1)

        @pl.when(i == 0)
        def _init():
            acc_ref[...] = jnp.zeros_like(acc_ref)

        blk = pl.program_id(0) * inner_b + i                 # logical block index
        d = x_ref[...].astype(jnp.float32) - g_ref[...].astype(jnp.float32)
        v = d * d if square else jnp.abs(d)
        # mask rows past the end of the data (block tail / padded grid steps)
        row = jax.lax.broadcasted_iota(jnp.int32, (block_r, LANE), 0) + blk * block_r
        v = jnp.where(row < valid_rows, v, 0.0)
        # (block_r,128) -> (8,128) partial sums: leading-dim VPU adds, no per-step XLU.
        acc_ref[...] += v.reshape(block_r // SUBLANE, SUBLANE, LANE).sum(axis=0)

    return kernel


def _choose_block_r(rows, itemsize):
    """Rows per tile: dtype-aware sublane multiple, capped at ~4 MiB per input tile."""
    sub = SUBLANE * max(1, 4 // max(1, itemsize))            # 8 f32, 16 bf16, 32 int8
    cap = ((4 * 1024 * 1024) // (LANE * itemsize) // sub) * sub
    rows_up = _round_up(rows, sub)
    return max(sub, min(rows_up, cap))


def _reduce_diff(x, gt, square):
    """sum over all elements of |x-gt| (or (x-gt)^2), accumulated in f32."""
    assert x.shape == gt.shape
    n = x.size
    xf = x.reshape(-1)
    gf = gt.reshape(-1)
    rem = n % LANE
    if rem:  # rare: tiny lane pad; padded positions equal in both -> diff 0
        pad = LANE - rem
        xf = jnp.pad(xf, (0, pad))
        gf = jnp.pad(gf, (0, pad))
    rows = xf.size // LANE
    x2 = xf.reshape(rows, LANE)
    g2 = gf.reshape(rows, LANE)

    block_r = _choose_block_r(rows, x2.dtype.itemsize)
    nb = pl.cdiv(rows, block_r)
    # 2 partials: enough to feed both v7x TensorCores; at most one padded (masked)
    # step on single-core chips (previous version wasted up to 7 partials).
    p_par = min(2, nb)
    inner = pl.cdiv(nb, p_par)

    def in_map(p, i):
        # padded grid steps re-read the last block; their rows are masked in-kernel
        return (jnp.minimum(p * inner + i, nb - 1), 0)

    kernel = _make_reduce_kernel(square, rows, block_r, inner)
    itemsize = x2.dtype.itemsize
    cost = pl.CostEstimate(flops=2 * n, transcendentals=0,
                           bytes_accessed=2 * n * itemsize + p_par * SUBLANE * LANE * 4)
    partial = pl.pallas_call(
        kernel,
        out_shape=jax.ShapeDtypeStruct((p_par * SUBLANE, LANE), jnp.float32),
        grid=(p_par, inner),
        in_specs=[pl.BlockSpec((block_r, LANE), in_map),
                  pl.BlockSpec((block_r, LANE), in_map)],
        out_specs=pl.BlockSpec((SUBLANE, LANE), lambda p, i: (p, 0)),
        compiler_params=pltpu.CompilerParams(
            dimension_semantics=("parallel", "arbitrary"),
            vmem_limit_bytes=32 * 1024 * 1024),   # 2 inputs x 2 buffers x 4 MiB tiles
        cost_estimate=cost,
    )(x2, g2)
    return jnp.sum(partial)


def _criterion(x, gt, kind):
    if kind == 'l1':                 # torch.nn.L1Loss (mean)
        return _reduce_diff(x, gt, square=False) / x.size
    if kind == 'l2':                 # torch.nn.MSELoss (mean)
        return _reduce_diff(x, gt, square=True) / x.size
    if kind == 'fro':                # torch.norm(x - gt, p='fro')
        return jnp.sqrt(_reduce_diff(x, gt, square=True))
    raise NotImplementedError(f'{kind} criterion has not been supported.')


# --------------------------------------------------------------------------- #
# input normalisation (plain jnp: trivial elementwise, XLA fuses it with the
# NCHW->NHWC transpose -- a dedicated Pallas pass only added an HBM round trip)
# --------------------------------------------------------------------------- #
def _normalize(x_nchw, use_input_norm, range_norm):
    x = x_nchw.astype(jnp.float32)
    if range_norm:                                  # [-1, 1] -> [0, 1]
        x = (x + 1.0) * 0.5
    if use_input_norm:                              # ImageNet mean / std
        mean = jnp.array([0.485, 0.456, 0.406], jnp.float32).reshape(1, 3, 1, 1)
        std = jnp.array([0.229, 0.224, 0.225], jnp.float32).reshape(1, 3, 1, 1)
        x = (x - mean) / std
    return x


# --------------------------------------------------------------------------- #
# 3x3 conv + bias (+ fused ReLU), bf16 MXU operands, f32 accumulation
# --------------------------------------------------------------------------- #
def _conv_taps_kernel(xf_ref, w_ref, b_ref, *out_refs, TH, W, Wp, want_pre, want_post):
    # xf_ref : (Lp, Cin)   flattened zero-padded row tile (incl. 2 halo rows), bf16
    # w_ref  : (3, 3, Cin, Cout) bf16 ; b_ref : (1, Cout) f32
    Cout = w_ref.shape[-1]
    rows = TH * Wp
    acc = jnp.zeros((rows, Cout), jnp.float32)
    for dy in range(3):
        for dx in range(3):
            # contiguous row-window slice of the flattened tile: no per-tap reshape copy
            patch = xf_ref[pl.ds(dy * Wp + dx, rows), :]
            acc = acc + jnp.dot(patch, w_ref[dy, dx],
                                preferred_element_type=jnp.float32)
    acc = acc + b_ref[...]
    # Wp is a multiple of 8 -> tile-aligned sublane split; drop wrap columns once.
    val = acc.reshape(TH, Wp, Cout)[:, :W, :]
    k = 0
    if want_pre:
        out_refs[k][...] = val.astype(out_refs[k].dtype)
        k += 1
    if want_post:                                   # fused ReLU (f32 math, bf16 store)
        out_refs[k][...] = jnp.maximum(val, 0.0).astype(out_refs[k].dtype)


def _conv_im2col_kernel(p_ref, w_ref, b_ref, *out_refs, want_pre, want_post):
    acc = jnp.dot(p_ref[...], w_ref[...], preferred_element_type=jnp.float32)
    acc = acc + b_ref[...]
    k = 0
    if want_pre:
        out_refs[k][...] = acc.astype(out_refs[k].dtype)
        k += 1
    if want_post:
        out_refs[k][...] = jnp.maximum(acc, 0.0).astype(out_refs[k].dtype)


def _conv_row_tile(H, Wp, W, Cin, Cout, n_outs):
    """Largest divisor of H whose per-step (double-buffered) tiles fit the budget."""
    def step_bytes(th):
        lp = _round_up((th + 2) * Wp + 2, SUBLANE)
        inp = 2 * lp * Cin * 2                      # bf16 input tile, x2 buffers
        acc = th * Wp * Cout * 4                    # live f32 accumulator
        out = 2 * n_outs * th * W * Cout * 2        # bf16 outputs, x2 buffers
        return inp + acc + out
    for th in sorted((d for d in range(1, H + 1) if H % d == 0), reverse=True):
        if step_bytes(th) <= _CONV_TILE_BUDGET:
            return th
    return 1


def _conv3x3_taps(x, w, b, want_pre, want_post):
    N, H, W, Cin = x.shape
    Cout = w.shape[-1]
    Wp = _round_up(W + 2, SUBLANE)                  # padded width, sublane aligned
    n_outs = int(want_pre) + int(want_post)
    TH = _conv_row_tile(H, Wp, W, Cin, Cout, n_outs)
    T = H // TH

    # zero pad: 1 row top/bottom, 1 col left, Wp-W-1 cols right (all in normalized space)
    xp = jnp.pad(x, ((0, 0), (1, 1), (1, Wp - W - 1), (0, 0)))
    if T == 1:
        xc = xp[:, None]                            # (N, 1, H+2, Wp, Cin), no duplication
    else:   # overlapping row chunks: 2-row halo duplicated once (~2/TH overhead)
        xc = jnp.stack([xp[:, t * TH:t * TH + TH + 2] for t in range(T)], axis=1)
    Lraw = (TH + 2) * Wp
    Lp = _round_up(Lraw + 2, SUBLANE)               # room for the shifted tap windows
    xf = xc.reshape(N, T, Lraw, Cin)
    xf = jnp.pad(xf, ((0, 0), (0, 0), (0, Lp - Lraw), (0, 0))).astype(_ACT_DTYPE)

    wb = w.astype(_ACT_DTYPE)
    bb = b.reshape(1, Cout).astype(jnp.float32)

    kernel = functools.partial(_conv_taps_kernel, TH=TH, W=W, Wp=Wp,
                               want_pre=want_pre, want_post=want_post)
    out_shape = tuple(jax.ShapeDtypeStruct((N, H, W, Cout), _ACT_DTYPE)
                      for _ in range(n_outs))
    out_specs = tuple(pl.BlockSpec((None, TH, W, Cout), lambda n, t: (n, t, 0, 0))
                      for _ in range(n_outs))
    res = pl.pallas_call(
        kernel,
        out_shape=out_shape,
        grid=(N, T),
        in_specs=[pl.BlockSpec((None, None, Lp, Cin), lambda n, t: (n, t, 0, 0)),
                  # TODO(synk): weight tile is still double-buffered by default;
                  # single-buffering it would reclaim ~half the weight VMEM at conv4/5.
                  pl.BlockSpec((3, 3, Cin, Cout), lambda n, t: (0, 0, 0, 0)),
                  pl.BlockSpec((1, Cout), lambda n, t: (0, 0))],
        out_specs=out_specs,
        compiler_params=pltpu.CompilerParams(
            dimension_semantics=("parallel", "parallel"),
            vmem_limit_bytes=_CONV_VMEM_LIMIT),
    )(xf, wb, bb)
    return res if isinstance(res, (tuple, list)) else (res,)


def _conv3x3_im2col(x, w, b, want_pre, want_post):
    """Cin tiny (conv1_1): merge all 9 taps into one K=9*Cin matmul (K=27 vs nine K=3)."""
    N, H, W, Cin = x.shape
    Cout = w.shape[-1]
    K = 9 * Cin
    n_outs = int(want_pre) + int(want_post)
    xp = jnp.pad(x, ((0, 0), (1, 1), (1, 1), (0, 0)))
    patches = jnp.concatenate([xp[:, dy:dy + H, dx:dx + W, :]
                               for dy in range(3) for dx in range(3)], axis=-1)
    p2 = patches.reshape(N, H * W, K).astype(_ACT_DTYPE)
    wf = w.reshape(K, Cout).astype(_ACT_DTYPE)      # matches (dy, dx, c) tap order
    bb = b.reshape(1, Cout).astype(jnp.float32)

    per_row = 2 * K * 2 + Cout * 4 + 2 * n_outs * Cout * 2
    TR = _pick_tile(H * W, max(SUBLANE, _CONV_TILE_BUDGET // per_row), SUBLANE)
    R = (H * W) // TR

    kernel = functools.partial(_conv_im2col_kernel,
                               want_pre=want_pre, want_post=want_post)
    out_shape = tuple(jax.ShapeDtypeStruct((N, H * W, Cout), _ACT_DTYPE)
                      for _ in range(n_outs))
    out_specs = tuple(pl.BlockSpec((None, TR, Cout), lambda n, r: (n, r, 0))
                      for _ in range(n_outs))
    res = pl.pallas_call(
        kernel,
        out_shape=out_shape,
        grid=(N, R),
        in_specs=[pl.BlockSpec((None, TR, K), lambda n, r: (n, r, 0)),
                  pl.BlockSpec((K, Cout), lambda n, r: (0, 0)),
                  pl.BlockSpec((1, Cout), lambda n, r: (0, 0))],
        out_specs=out_specs,
        compiler_params=pltpu.CompilerParams(
            dimension_semantics=("parallel", "parallel"),
            vmem_limit_bytes=_CONV_VMEM_LIMIT),
    )(p2, wf, bb)
    res = res if isinstance(res, (tuple, list)) else (res,)
    return tuple(r.reshape(N, H, W, Cout) for r in res)


def _conv3x3(x, w, b, *, want_pre, want_post):
    if x.shape[-1] <= 8:
        return _conv3x3_im2col(x, w, b, want_pre, want_post)
    return _conv3x3_taps(x, w, b, want_pre, want_post)


# --------------------------------------------------------------------------- #
# 2x2 max pool: C on the lane dim, many pooled rows per step
# --------------------------------------------------------------------------- #
def _maxpool2_kernel(x_ref, o_ref):
    # x_ref: (TB, 2, Wt, C) -> o_ref: (TB, Wt//2, C); minor dims are (Wt, C) / (Wo, C)
    TB, _, Wt, C = x_ref.shape
    Wo = Wt // 2
    x = x_ref[...]
    v = jnp.maximum(x[:, 0], x[:, 1])                        # vertical pair max (VPU)
    o_ref[...] = jnp.max(v.reshape(TB, Wo, 2, C), axis=2)    # horizontal pair max


def _maxpool2(x):
    N, H, W, C = x.shape
    Ho, Wo = H // 2, W // 2           # torch MaxPool2d(2) floor-truncates odd dims
    Wt = 2 * Wo
    xr = x[:, :2 * Ho, :Wt, :].reshape(N, Ho, 2, Wt, C)
    isz = x.dtype.itemsize
    per_row = 2 * 2 * Wt * C * isz + 2 * Wo * C * isz        # double-buffered in + out
    TB = _pick_tile(Ho, max(8, (4 * 1024 * 1024) // max(1, per_row)), 1)
    return pl.pallas_call(
        _maxpool2_kernel,
        out_shape=jax.ShapeDtypeStruct((N, Ho, Wo, C), x.dtype),
        grid=(N, Ho // TB),
        in_specs=[pl.BlockSpec((None, TB, 2, Wt, C), lambda n, t: (n, t, 0, 0, 0))],
        out_specs=pl.BlockSpec((None, TB, Wo, C), lambda n, t: (n, t, 0, 0)),
        compiler_params=pltpu.CompilerParams(
            dimension_semantics=("parallel", "parallel")),
    )(xr)


# --------------------------------------------------------------------------- #
# Gram matrix: K-tiled over H*W chunks, resident (C,C) f32 output accumulator
# --------------------------------------------------------------------------- #
def _gram_kernel(f_ref, o_ref, *, scale):
    @pl.when(pl.program_id(1) == 0)
    def _init():
        o_ref[...] = jnp.zeros_like(o_ref)

    f = f_ref[...]                                           # (TK, C) bf16 chunk
    o_ref[...] += jax.lax.dot_general(f, f, (((0,), (0,)), ((), ())),
                                      preferred_element_type=jnp.float32)

    @pl.when(pl.program_id(1) == pl.num_programs(1) - 1)
    def _fin():
        o_ref[...] = o_ref[...] * scale


def _gram(f_nhwc):
    N, H, W, C = f_nhwc.shape
    HW = H * W
    f2 = f_nhwc.reshape(N, HW, C).astype(_ACT_DTYPE)
    TK = _pick_tile(HW, max(SUBLANE, (2 * 1024 * 1024) // max(1, C * 2)), SUBLANE)
    kernel = functools.partial(_gram_kernel, scale=1.0 / (C * H * W))
    return pl.pallas_call(
        kernel,
        out_shape=jax.ShapeDtypeStruct((N, C, C), jnp.float32),
        grid=(N, HW // TK),
        in_specs=[pl.BlockSpec((None, TK, C), lambda n, k: (n, k, 0))],
        out_specs=pl.BlockSpec((None, C, C), lambda n, k: (n, 0, 0)),
        compiler_params=pltpu.CompilerParams(
            dimension_semantics=("parallel", "arbitrary")),
    )(f2)


# --------------------------------------------------------------------------- #
# VGG19 architecture (torchvision ordering, basicsr layer names)
# --------------------------------------------------------------------------- #
_VGG19_LAYERS = [
    'conv1_1', 'relu1_1', 'conv1_2', 'relu1_2', 'pool1',
    'conv2_1', 'relu2_1', 'conv2_2', 'relu2_2', 'pool2',
    'conv3_1', 'relu3_1', 'conv3_2', 'relu3_2', 'conv3_3', 'relu3_3',
    'conv3_4', 'relu3_4', 'pool3',
    'conv4_1', 'relu4_1', 'conv4_2', 'relu4_2', 'conv4_3', 'relu4_3',
    'conv4_4', 'relu4_4', 'pool4',
    'conv5_1', 'relu5_1', 'conv5_2', 'relu5_2', 'conv5_3', 'relu5_3',
    'conv5_4', 'relu5_4', 'pool5',
]
_VGG19_BLOCK_CH = {1: 64, 2: 128, 3: 256, 4: 512, 5: 512}


def _vgg19_conv_channels():
    ch = {}
    prev = 3
    for name in _VGG19_LAYERS:
        if name.startswith('conv'):
            out = _VGG19_BLOCK_CH[int(name[4])]
            ch[name] = (prev, out)
            prev = out
    return ch


class PerceptualLossPallas:
    """JAX/Pallas port of basicsr PerceptualLoss.forward."""

    def __init__(self, layer_weights, vgg_type='vgg19', use_input_norm=True,
                 range_norm=False, perceptual_weight=1.0, style_weight=0.0,
                 criterion='l1', param_key=None):
        if vgg_type != 'vgg19':
            raise NotImplementedError('only vgg19 is implemented here')
        if criterion not in ('l1', 'l2', 'fro'):
            raise NotImplementedError(f'{criterion} criterion has not been supported.')
        self.layer_weights = dict(layer_weights)
        self.use_input_norm = use_input_norm
        self.range_norm = range_norm
        self.perceptual_weight = perceptual_weight
        self.style_weight = style_weight
        self.criterion_type = criterion

        max_idx = max(_VGG19_LAYERS.index(k) for k in self.layer_weights)
        self.layers = _VGG19_LAYERS[:max_idx + 1]

        # TODO(synk): real pretrained VGG19 weights unavailable in-script; deterministic
        #             He-init random weights with identical architecture are used instead.
        key = jax.random.PRNGKey(0) if param_key is None else param_key
        ch = _vgg19_conv_channels()
        self.params = {}
        for name in self.layers:
            if name.startswith('conv'):
                cin, cout = ch[name]
                key, kw = jax.random.split(key)
                w = jax.random.normal(kw, (3, 3, cin, cout), jnp.float32)
                w = w * jnp.sqrt(2.0 / (9.0 * cin))
                self.params[name] = {'w': w, 'b': jnp.zeros((cout,), jnp.float32)}

    # ---- feature extractor ------------------------------------------------ #
    def _features(self, x_nchw):
        wanted = set(self.layer_weights)
        x = _normalize(x_nchw, self.use_input_norm, self.range_norm)
        x = jnp.transpose(x, (0, 2, 3, 1)).astype(_ACT_DTYPE)   # NCHW -> NHWC, bf16
        feats = {}
        i = 0
        n_layers = len(self.layers)
        while i < n_layers:
            name = self.layers[i]
            if name.startswith('conv'):
                nxt = self.layers[i + 1] if i + 1 < n_layers else ''
                next_relu = nxt.startswith('relu')
                want_pre = (name in wanted) or (not next_relu)
                want_post = next_relu                           # ReLU always fused
                p = self.params[name]
                outs = _conv3x3(x, p['w'], p['b'],
                                want_pre=want_pre, want_post=want_post)
                k = 0
                pre = None
                if want_pre:
                    pre = outs[k]
                    k += 1
                    if name in wanted:
                        feats[name] = pre
                if want_post:
                    x = outs[k]
                    if nxt in wanted:
                        feats[nxt] = x
                    i += 1                                      # consume the fused relu
                else:
                    x = pre
            elif name.startswith('relu'):
                # unreachable for vgg19 (relu is always fused into the preceding conv)
                x = jnp.maximum(x, 0).astype(_ACT_DTYPE)
                if name in wanted:
                    feats[name] = x
            else:                                               # poolX
                x = _maxpool2(x)
                if name in wanted:
                    feats[name] = x
            i += 1
        return feats                                            # NHWC bf16 features

    # ---- forward ----------------------------------------------------------- #
    def __call__(self, x, gt):
        x_feats = self._features(x)
        gt_feats = self._features(jax.lax.stop_gradient(gt))    # gt.detach()

        percep_loss = None
        if self.perceptual_weight > 0:
            percep_loss = jnp.float32(0.0)
            for k, lw in self.layer_weights.items():
                percep_loss = percep_loss + _criterion(x_feats[k], gt_feats[k],
                                                       self.criterion_type) * lw
            percep_loss = percep_loss * self.perceptual_weight

        style_loss = None
        if self.style_weight > 0:
            style_loss = jnp.float32(0.0)
            for k, lw in self.layer_weights.items():
                gx = _gram(x_feats[k])
                gg = _gram(gt_feats[k])
                style_loss = style_loss + _criterion(gx, gg, self.criterion_type) * lw
            style_loss = style_loss * self.style_weight

        return percep_loss, style_loss


# --------------------------------------------------------------------------- #
# pure-JAX reference (same math & dtype policy, no Pallas) for correctness check
# --------------------------------------------------------------------------- #
def _ref_forward(x, gt, loss):
    def conv3x3(z, w, b):
        N, H, W, Cin = z.shape
        Cout = w.shape[-1]
        zp = jnp.pad(z, ((0, 0), (1, 1), (1, 1), (0, 0)))
        wb = w.astype(jnp.bfloat16)
        acc = jnp.zeros((N, H, W, Cout), jnp.float32)
        for dy in range(3):
            for dx in range(3):
                acc = acc + jnp.einsum('nhwc,cd->nhwd',
                                       zp[:, dy:dy + H, dx:dx + W, :], wb[dy, dx],
                                       preferred_element_type=jnp.float32)
        return acc + b

    def pool(z):
        N, H, W, C = z.shape
        z = z[:, :2 * (H // 2), :2 * (W // 2), :]
        return z.reshape(N, H // 2, 2, W // 2, 2, C).max(axis=(2, 4))

    def features(z_nchw):
        z = _normalize(z_nchw, loss.use_input_norm, loss.range_norm)
        z = jnp.transpose(z, (0, 2, 3, 1)).astype(jnp.bfloat16)
        feats = {}
        i = 0
        while i < len(loss.layers):
            name = loss.layers[i]
            if name.startswith('conv'):
                acc = conv3x3(z, loss.params[name]['w'], loss.params[name]['b'])
                if name in loss.layer_weights:
                    feats[name] = acc.astype(jnp.bfloat16)
                nxt = loss.layers[i + 1] if i + 1 < len(loss.layers) else ''
                if nxt.startswith('relu'):
                    z = jnp.maximum(acc, 0.0).astype(jnp.bfloat16)
                    if nxt in loss.layer_weights:
                        feats[nxt] = z
                    i += 1
                else:
                    z = acc.astype(jnp.bfloat16)
            elif name.startswith('relu'):
                z = jnp.maximum(z.astype(jnp.float32), 0.0).astype(jnp.bfloat16)
                if name in loss.layer_weights:
                    feats[name] = z
            else:
                z = pool(z)
                if name in loss.layer_weights:
                    feats[name] = z
            i += 1
        return feats

    def crit(a, b):
        d = a.astype(jnp.float32) - b.astype(jnp.float32)
        if loss.criterion_type == 'l1':
            return jnp.mean(jnp.abs(d))
        if loss.criterion_type == 'l2':
            return jnp.mean(d * d)
        return jnp.sqrt(jnp.sum(d * d))

    def gram(f):
        N, H, W, C = f.shape
        f2 = f.reshape(N, H * W, C)
        return jnp.einsum('nkc,nkd->ncd', f2, f2,
                          preferred_element_type=jnp.float32) / (C * H * W)

    xf, gf = features(x), features(gt)
    percep = None
    if loss.perceptual_weight > 0:
        percep = sum(crit(xf[k], gf[k]) * w for k, w in loss.layer_weights.items())
        percep = percep * loss.perceptual_weight
    style = None
    if loss.style_weight > 0:
        style = sum(crit(gram(xf[k]), gram(gf[k])) * w
                    for k, w in loss.layer_weights.items())
        style = style * loss.style_weight
    return percep, style


# --------------------------------------------------------------------------- #
if __name__ == "__main__":
    key = jax.random.PRNGKey(0)
    kx, kg = jax.random.split(key)
    N, C, H, W = 2, 3, 16, 16
    x = jax.random.uniform(kx, (N, C, H, W), dtype=jnp.float32)
    gt = jax.random.uniform(kg, (N, C, H, W), dtype=jnp.float32)

    loss = PerceptualLossPallas(
        layer_weights={'conv1_2': 0.25, 'conv2_2': 0.75},
        vgg_type='vgg19', use_input_norm=True, range_norm=False,
        perceptual_weight=1.0, style_weight=0.5, criterion='l1')

    percep, style = loss(x, gt)
    jax.block_until_ready((percep, style))

    percep_ref, style_ref = _ref_forward(x, gt, loss)
    assert bool(jnp.isfinite(percep)) and bool(jnp.isfinite(style))
    assert jnp.allclose(percep, percep_ref, rtol=5e-2, atol=1e-4), (percep, percep_ref)
    assert jnp.allclose(style, style_ref, rtol=5e-2, atol=1e-4), (style, style_ref)

    print("KERNEL_OK")
</pallas_src>

<mosaic_0001>
module attributes {stable_mosaic.version = 11 : i64} {
  func.func @_conv_im2col_kernel(%arg0: i32, %arg1: i32, %arg2: memref<1x256x27xbf16, #tpu.memory_space<vmem>>, %arg3: memref<27x64xbf16, #tpu.memory_space<vmem>>, %arg4: memref<1x64xf32, #tpu.memory_space<vmem>>, %arg5: memref<1x256x64xbf16, #tpu.memory_space<vmem>>) attributes {dimension_semantics = [#tpu.dimension_semantics<parallel>, #tpu.dimension_semantics<parallel>], iteration_bounds = array<i64: 2, 1>, scalar_prefetch = 0 : i64, scratch_operands = 0 : i64, tpu.core_type = #tpu.core_type<tc>, window_params = [{transform_indices = @transform_0, window_bounds = array<i64: 1, 256, 27>}, {pipeline_mode = #tpu.pipeline_mode<synchronous>, transform_indices = @transform_1, window_bounds = array<i64: 27, 64>}, {pipeline_mode = #tpu.pipeline_mode<synchronous>, transform_indices = @transform_2, window_bounds = array<i64: 1, 64>}, {transform_indices = @transform_3, window_bounds = array<i64: 1, 256, 64>}]} {
    %c0 = arith.constant 0 : index
    %c0_0 = arith.constant 0 : index
    %c0_1 = arith.constant 0 : index
    %0 = vector.load %arg2[%c0, %c0_0, %c0_1] : memref<1x256x27xbf16, #tpu.memory_space<vmem>>, vector<1x256x27xbf16>
    %1 = vector.shape_cast %0 : vector<1x256x27xbf16> to vector<256x27xbf16>
    %c0_2 = arith.constant 0 : index
    %c0_3 = arith.constant 0 : index
    %2 = vector.load %arg3[%c0_2, %c0_3] : memref<27x64xbf16, #tpu.memory_space<vmem>>, vector<27x64xbf16>
    %cst = arith.constant dense<0.000000e+00> : vector<256x64xf32>
    %3 = tpu.matmul %1, %2, %cst {dimension_numbers = #tpu.dot_dimension_numbers<[1], [0], [0], [1], [0, 0, 1, 1], [], []>} : vector<256x27xbf16>, vector<27x64xbf16>, vector<256x64xf32> -> vector<256x64xf32>
    %c0_4 = arith.constant 0 : index
    %c0_5 = arith.constant 0 : index
    %4 = vector.load %arg4[%c0_4, %c0_5] : memref<1x64xf32, #tpu.memory_space<vmem>>, vector<1x64xf32>
    %5 = vector.broadcast %4 : vector<1x64xf32> to vector<256x64xf32>
    %6 = arith.addf %3, %5 : vector<256x64xf32>
    %cst_6 = arith.constant 0.000000e+00 : f32
    %7 = vector.broadcast %cst_6 : f32 to vector<256x64xf32>
    %8 = arith.maximumf %6, %7 : vector<256x64xf32>
    %9 = arith.truncf %8 : vector<256x64xf32> to vector<256x64xbf16>
    %c0_7 = arith.constant 0 : index
    %c0_8 = arith.constant 0 : index
    %c0_9 = arith.constant 0 : index
    %10 = vector.load %arg5[%c0_7, %c0_8, %c0_9] : memref<1x256x64xbf16, #tpu.memory_space<vmem>>, vector<1x256x64xbf16>
    %11 = vector.shape_cast %10 : vector<1x256x64xbf16> to vector<256x64xbf16>
    %12 = vector.shape_cast %9 : vector<256x64xbf16> to vector<1x256x64xbf16>
    tpu.vector_store %arg5[%c0_7, %c0_8, %c0_9], %12 {strides = array<i32>} : memref<1x256x64xbf16, #tpu.memory_space<vmem>>, vector<1x256x64xbf16>,
    return
  }
  func.func @transform_0(%arg0: i32, %arg1: i32) -> (i32, i32, i32) {
    %c0_i32 = arith.constant 0 : i32
    %c0_i32_0 = arith.constant 0 : i32
    return %arg0, %arg1, %c0_i32 : i32, i32, i32
  }
  func.func @transform_1(%arg0: i32, %arg1: i32) -> (i32, i32) {
    %c0_i32 = arith.constant 0 : i32
    %c0_i32_0 = arith.constant 0 : i32
    %c0_i32_1 = arith.constant 0 : i32
    return %c0_i32, %c0_i32_0 : i32, i32
  }
  func.func @transform_2(%arg0: i32, %arg1: i32) -> (i32, i32) {
    %c0_i32 = arith.constant 0 : i32
    %c0_i32_0 = arith.constant 0 : i32
    %c0_i32_1 = arith.constant 0 : i32
    return %c0_i32, %c0_i32_0 : i32, i32
  }
  func.func @transform_3(%arg0: i32, %arg1: i32) -> (i32, i32, i32) {
    %c0_i32 = arith.constant 0 : i32
    %c0_i32_0 = arith.constant 0 : i32
    return %arg0, %arg1, %c0_i32 : i32, i32, i32
  }
}

</mosaic_0001>

<bundles_post_ra>
// kernel: tpu_custom_call.1
= control target key start
LH: loop header
LB: loop body
LE: loop exit
PB: predicated region body
PF: predicated region fallthrough
CT: control target
= control target key end

     0   :  { %s1100_s12 = smov 0   ;;  %s1102_s13 = smov 0   ;;  %s1283_s0 = inlined_call_operand.vmem [shape: bf16[2,256,27], index: 0, kind: input, shape index: {}]   ;;  %s1284_s1 = inlined_call_operand.vmem [shape: bf16[27,64], index: 1, kind: input, shape index: {}]   ;;  %s1285_s2 = inlined_call_operand.vmem [shape: f32[1,64], index: 2, kind: input, shape index: {}]   ;;  %s1286_s3 = inlined_call_operand.vmem [shape: bf16[2,256,64], index: 3, kind: output, shape index: {}]  }
   0x1   :  { %s1104_s14 = smov 0  }
   0x2 LB: > { %s25_s15 = sadd.s32 1, %s1073_s13  ;;  %p846_p0 = scmp.ge.s32.totalorder %s1077_s14, 1  ;;  %s1077_s14 = sphi %s1104_s14, %s13_s14   ;;  %s1073_s13 = sphi %s1102_s13, %s1288_s13   ;;  %s1069_s12 = sphi %s1100_s12, %s1287_s12  }
   0x3   : > { %p27_p1 = scmp.ge.s32.totalorder %s25_s15, 2  ;;  %p158_p2 = scmp.lt.s32.totalorder %s1077_s14, 3 }
   0x5   : > { %s1290_s15 = smov (%p27_p1, %s25_s15), 0  ;;  %p159_p3 = pnand %p846_p0, %p158_p2 }
   0x6   : > { %p191_p4 = scmp.lt.s32.totalorder (!%p159_p3), %s1069_s12, 1 }
   0x7   : > { %162 = sbr.rel (%p159_p3) target bundleno = 256 (0x100), region = 32 }
   0xc   : > { %v1037_v0 = vld [vmem:[%s1284_s1 + $0x8] sm:$0x3f]   ;;  %vm394_vm0 = vcmask 1044480   ;;  %vm395_vm1 = vcmask 1045504   ;;  %v1079_v1 = vmov 65535   ;;  %v1038_v5 = vld [vmem:[%s1284_s1] sm:$0xff]  }
   0xd   : > { %v396_v2 = vsel %vm394_vm0, 4294967295, %v1079_v1  ;;  %s1292_s12 = smov (!%p191_p4, %s1069_s12), 1  ;;  %vm345_vm2 = vcmask 220160   ;;  %v1169_v22 = vld [vmem:[%s1285_s2] ss:$0 sm:$0xff]  ;;  %vm722_vm3 = vcmask 519168  }
   0xe   : > { %v397_v3 = vsel %vm395_vm1, %v396_v2, 0  ;;  %s920_s20 = sshll.u32 %s1292_s12, 7 }
   0xf   : > { %v399_v4 = vand.u32 %v1037_v0, %v397_v3  ;;  %s1132_s23 = scalar_lea.vmem %s1283_s0, %s920_s20  ;;  %s1180_s28 = scalar_lea.vmem %s1286_s3, %s920_s20 }
  0x10   : > { %v1039_v6 = vld [vmem:[%s1132_s23] sm:$0xff]   ;;  %v1041_v8 = vld [vmem:[%s1132_s23 + $0x8] sm:$0xff]   ;;  %v1043_v10 = vld [vmem:[%s1132_s23 + $0x10] sm:$0xff]  }
  0x11   : > { %972 = vmatprep.subr.bf16.mxu0 %v399_v4  ;;  %1008 = vmatprep.subr.bf16.mxu1 %v399_v4  ;;  %v1040_v7 = vld [vmem:[%s1132_s23 + $0x40] sm:$0xff]   ;;  %v1042_v9 = vld [vmem:[%s1132_s23 + $0x48] sm:$0xff]   ;;  %v1044_v11 = vld [vmem:[%s1132_s23 + $0x50] sm:$0xff]  }
  0x12   : > { %973 = vmatpush3.bf16.msra.mxu0 %v399_v4  ;;  %1010 = vmatpush3.bf16.msra.mxu1 %v399_v4  ;;  %v1045_v12 = vld [vmem:[%s1132_s23 + $0x18] sm:$0xff]   ;;  %v1047_v14 = vld [vmem:[%s1132_s23 + $0x20] sm:$0xff]   ;;  %v1049_v16 = vld [vmem:[%s1132_s23 + $0x28] sm:$0xff]  }
  0x13   : > { %974 = vmatprep.subr.bf16.mxu0 %v1038_v5  ;;  %1009 = vmatprep.subr.bf16.mxu1 %v1038_v5  ;;  %v1046_v13 = vld [vmem:[%s1132_s23 + $0x58] sm:$0xff]   ;;  %v1048_v15 = vld [vmem:[%s1132_s23 + $0x60] sm:$0xff]   ;;  %v1050_v17 = vld [vmem:[%s1132_s23 + $0x68] sm:$0xff]  }
  0x14   : > { %976 = vmatprep.mubr.msk.bf16.mxu0 %vm345_vm2, %v1039_v6  ;;  %992 = vmatprep.mubr.msk.bf16.mxu1 %vm345_vm2, %v1040_v7  ;;  %v1051_v18 = vld [vmem:[%s1132_s23 + $0x30] sm:$0xff]   ;;  %v1053_v20 = vld [vmem:[%s1132_s23 + $0x38] sm:$0xff]  }
  0x15   : > { %v1052_v19 = vld [vmem:[%s1132_s23 + $0x70] sm:$0xff]   ;;  %v1054_v21 = vld [vmem:[%s1132_s23 + $0x78] sm:$0xff]  }
  0x16   : > { %975 = vmatpush3.bf16.msra.mxu0 %v1038_v5  ;;  %1011 = vmatpush3.bf16.msra.mxu1 %v1038_v5 }
  0x19   : > { %977 = vmatmul.mubr.msk.bf16.vlgmr.msra.gmra.mxu0 %vm345_vm2, %v1041_v8  ;;  %993 = vmatmul.mubr.msk.bf16.vlgmr.msra.gmra.mxu1 %vm345_vm2, %v1042_v9 }
  0x1a   : > { %980 = vmatprep.mubr.msk.bf16.mxu0 %vm345_vm2, %v1043_v10  ;;  %996 = vmatprep.mubr.msk.bf16.mxu1 %vm345_vm2, %v1044_v11 }
  0x21   : > { %981 = vmatmul.mubr.msk.bf16.gmra.mxu0 %vm345_vm2, %v1045_v12  ;;  %997 = vmatmul.mubr.msk.bf16.gmra.mxu1 %vm345_vm2, %v1046_v13 }
  0x22   : > { %984 = vmatprep.mubr.msk.bf16.mxu0 %vm345_vm2, %v1047_v14  ;;  %1000 = vmatprep.mubr.msk.bf16.mxu1 %vm345_vm2, %v1048_v15 }
  0x29   : > { %985 = vmatmul.mubr.msk.bf16.gmra.mxu0 %vm345_vm2, %v1049_v16  ;;  %1001 = vmatmul.mubr.msk.bf16.gmra.mxu1 %vm345_vm2, %v1050_v17 }
  0x2a   : > { %988 = vmatprep.mubr.msk.bf16.mxu0 %vm345_vm2, %v1051_v18  ;;  %1004 = vmatprep.mubr.msk.bf16.mxu1 %vm345_vm2, %v1052_v19 }
  0x31   : > { %989 = vmatmul.mubr.msk.bf16.gmra.mxu0 %vm345_vm2, %v1053_v20  ;;  %1005 = vmatmul.mubr.msk.bf16.gmra.mxu1 %vm345_vm2, %v1054_v21 }
  0xd9   : > { %v978_v23 = vpop.f32.mrf.mxu0  ;;  %v994_v24 = vpop.f32.mrf.mxu1 }
  0xda   : > { %v444_v25 = vadd.f32 %v978_v23, %v1169_v22  ;;  %v508_v26 = vadd.f32 %v994_v24, %v1169_v22 }
  0xdb   : > { %v435_v27 = vpop.f32.mrf.mxu0  ;;  %v499_v28 = vpop.f32.mrf.mxu1 }
  0xdc   : > { %v564_v29 = vmax.f32 %v444_v25, 0.0  ;;  %v580_v30 = vmax.f32 %v508_v26, 0.0  ;;  %v436_v31 = vadd.f32 %v1169_v22, %v435_v27  ;;  %v500_v32 = vadd.f32 %v1169_v22, %v499_v28 }
  0xdd   : > { %v979_v33 = vpop.f32.mrf.mxu0  ;;  %v995_v34 = vpop.f32.mrf.mxu1 }
  0xde   : > { %v924_v35 = vpack.c.bf16 %v564_v29, %v564_v29  ;;  %v940_v36 = vpack.c.bf16 %v580_v30, %v580_v30  ;;  %v562_v37 = vmax.f32 %v436_v31, 0.0  ;;  %v578_v38 = vmax.f32 %v500_v32, 0.0 }
  0xdf   : > { %v447_v39 = vadd.f32 %v979_v33, %v1169_v22  ;;  %v511_v40 = vadd.f32 %v995_v34, %v1169_v22  ;;  %v438_v41 = vpop.f32.mrf.mxu0  ;;  %v502_v42 = vpop.f32.mrf.mxu1 }
  0xe0   : > { %725 = vst.msk [vmem:[%s1180_s28 + $0x8] sm:$0xf] %vm722_vm3, %v924_v35  ;;  %741 = vst.msk [vmem:[%s1180_s28 + $0x48] sm:$0xf] %vm722_vm3, %v940_v36  ;;  %v922_v43 = vpack.c.bf16 %v562_v37, %v562_v37  ;;  %v938_v44 = vpack.c.bf16 %v578_v38, %v578_v38  ;;  %v439_v45 = vadd.f32 %v1169_v22, %v438_v41 }
  0xe1   : > { %v503_v46 = vadd.f32 %v1169_v22, %v502_v42  ;;  %v565_v47 = vmax.f32 %v447_v39, 0.0  ;;  %v581_v48 = vmax.f32 %v511_v40, 0.0  ;;  %v982_v49 = vpop.f32.mrf.mxu0  ;;  %v998_v50 = vpop.f32.mrf.mxu1 }
  0xe2   : > { %723 = vst.msk [vmem:[%s1180_s28] sm:$0xf] %vm722_vm3, %v922_v43  ;;  %739 = vst.msk [vmem:[%s1180_s28 + $0x40] sm:$0xf] %vm722_vm3, %v938_v44  ;;  %v563_v51 = vmax.f32 %v439_v45, 0.0  ;;  %v460_v53 = vadd.f32 %v982_v49, %v1169_v22  ;;  %v524_v54 = vadd.f32 %v998_v50, %v1169_v22 }
  0xe3   : > { %v579_v52 = vmax.f32 %v503_v46, 0.0  ;;  %v925_v55 = vpack.c.bf16 %v565_v47, %v565_v47  ;;  %v941_v56 = vpack.c.bf16 %v581_v48, %v581_v48  ;;  %v451_v57 = vpop.f32.mrf.mxu0  ;;  %v515_v58 = vpop.f32.mrf.mxu1 }
  0xe4   : > { %v923_v59 = vpack.c.bf16 %v563_v51, %v563_v51  ;;  %v568_v61 = vmax.f32 %v460_v53, 0.0  ;;  %v584_v62 = vmax.f32 %v524_v54, 0.0  ;;  %v452_v63 = vadd.f32 %v1169_v22, %v451_v57 }
  0xe5   : > { %v939_v60 = vpack.c.bf16 %v579_v52, %v579_v52  ;;  %726 = vst.msk [vmem:[%s1180_s28 + $0xc] sm:$0xf] %vm722_vm3, %v925_v55  ;;  %742 = vst.msk [vmem:[%s1180_s28 + $0x4c] sm:$0xf] %vm722_vm3, %v941_v56  ;;  %v516_v0 = vadd.f32 %v1169_v22, %v515_v58  ;;  %v983_v1 = vpop.f32.mrf.mxu0  ;;  %v999_v2 = vpop.f32.mrf.mxu1 }
  0xe6   : > { %724 = vst.msk [vmem:[%s1180_s28 + $0x4] sm:$0xf] %vm722_vm3, %v923_v59  ;;  %v928_v3 = vpack.c.bf16 %v568_v61, %v568_v61  ;;  %v944_v4 = vpack.c.bf16 %v584_v62, %v584_v62  ;;  %v463_v5 = vadd.f32 %v983_v1, %v1169_v22  ;;  %v527_v6 = vadd.f32 %v999_v2, %v1169_v22 }
  0xe7   : > { %740 = vst.msk [vmem:[%s1180_s28 + $0x44] sm:$0xf] %vm722_vm3, %v939_v60  ;;  %v566_v7 = vmax.f32 %v452_v63, 0.0  ;;  %v582_v8 = vmax.f32 %v516_v0, 0.0  ;;  %v454_v9 = vpop.f32.mrf.mxu0  ;;  %v518_v10 = vpop.f32.mrf.mxu1 }
  0xe8   : > { %729 = vst.msk [vmem:[%s1180_s28 + $0x18] sm:$0xf] %vm722_vm3, %v928_v3  ;;  %745 = vst.msk [vmem:[%s1180_s28 + $0x58] sm:$0xf] %vm722_vm3, %v944_v4  ;;  %v569_v11 = vmax.f32 %v463_v5, 0.0  ;;  %v585_v12 = vmax.f32 %v527_v6, 0.0  ;;  %v455_v13 = vadd.f32 %v1169_v22, %v454_v9  ;;  %v519_v14 = vadd.f32 %v1169_v22, %v518_v10 }
  0xe9   : > { %v926_v15 = vpack.c.bf16 %v566_v7, %v566_v7  ;;  %v942_v16 = vpack.c.bf16 %v582_v8, %v582_v8  ;;  %v986_v17 = vpop.f32.mrf.mxu0  ;;  %v1002_v18 = vpop.f32.mrf.mxu1 }
  0xea   : > { %v929_v19 = vpack.c.bf16 %v569_v11, %v569_v11  ;;  %v945_v20 = vpack.c.bf16 %v585_v12, %v585_v12  ;;  %v567_v21 = vmax.f32 %v455_v13, 0.0  ;;  %v583_v23 = vmax.f32 %v519_v14, 0.0 }
  0xeb   : > { %727 = vst.msk [vmem:[%s1180_s28 + $0x10] sm:$0xf] %vm722_vm3, %v926_v15  ;;  %743 = vst.msk [vmem:[%s1180_s28 + $0x50] sm:$0xf] %vm722_vm3, %v942_v16  ;;  %v476_v24 = vadd.f32 %v986_v17, %v1169_v22  ;;  %v540_v25 = vadd.f32 %v1002_v18, %v1169_v22  ;;  %v467_v26 = vpop.f32.mrf.mxu0  ;;  %v531_v27 = vpop.f32.mrf.mxu1 }
  0xec   : > { %730 = vst.msk [vmem:[%s1180_s28 + $0x1c] sm:$0xf] %vm722_vm3, %v929_v19  ;;  %746 = vst.msk [vmem:[%s1180_s28 + $0x5c] sm:$0xf] %vm722_vm3, %v945_v20  ;;  %v927_v28 = vpack.c.bf16 %v567_v21, %v567_v21  ;;  %v943_v29 = vpack.c.bf16 %v583_v23, %v583_v23  ;;  %v468_v30 = vadd.f32 %v1169_v22, %v467_v26 }
  0xed   : > { %v532_v31 = vadd.f32 %v1169_v22, %v531_v27  ;;  %v572_v32 = vmax.f32 %v476_v24, 0.0  ;;  %v588_v33 = vmax.f32 %v540_v25, 0.0  ;;  %v987_v34 = vpop.f32.mrf.mxu0  ;;  %v1003_v35 = vpop.f32.mrf.mxu1 }
  0xee   : > { %728 = vst.msk [vmem:[%s1180_s28 + $0x14] sm:$0xf] %vm722_vm3, %v927_v28  ;;  %744 = vst.msk [vmem:[%s1180_s28 + $0x54] sm:$0xf] %vm722_vm3, %v943_v29  ;;  %v570_v36 = vmax.f32 %v468_v30, 0.0  ;;  %v479_v38 = vadd.f32 %v987_v34, %v1169_v22  ;;  %v543_v39 = vadd.f32 %v1003_v35, %v1169_v22 }
  0xef   : > { %v586_v37 = vmax.f32 %v532_v31, 0.0  ;;  %v932_v40 = vpack.c.bf16 %v572_v32, %v572_v32  ;;  %v948_v41 = vpack.c.bf16 %v588_v33, %v588_v33  ;;  %v470_v42 = vpop.f32.mrf.mxu0  ;;  %v534_v43 = vpop.f32.mrf.mxu1 }
  0xf0   : > { %v930_v44 = vpack.c.bf16 %v570_v36, %v570_v36  ;;  %v573_v46 = vmax.f32 %v479_v38, 0.0  ;;  %v589_v47 = vmax.f32 %v543_v39, 0.0  ;;  %v471_v48 = vadd.f32 %v1169_v22, %v470_v42 }
  0xf1   : > { %v946_v45 = vpack.c.bf16 %v586_v37, %v586_v37  ;;  %733 = vst.msk [vmem:[%s1180_s28 + $0x28] sm:$0xf] %vm722_vm3, %v932_v40  ;;  %749 = vst.msk [vmem:[%s1180_s28 + $0x68] sm:$0xf] %vm722_vm3, %v948_v41  ;;  %v535_v49 = vadd.f32 %v1169_v22, %v534_v43  ;;  %v990_v50 = vpop.f32.mrf.mxu0  ;;  %v1006_v51 = vpop.f32.mrf.mxu1 }
  0xf2   : > { %731 = vst.msk [vmem:[%s1180_s28 + $0x20] sm:$0xf] %vm722_vm3, %v930_v44  ;;  %v933_v52 = vpack.c.bf16 %v573_v46, %v573_v46  ;;  %v949_v53 = vpack.c.bf16 %v589_v47, %v589_v47  ;;  %v492_v54 = vadd.f32 %v990_v50, %v1169_v22  ;;  %v556_v55 = vadd.f32 %v1006_v51, %v1169_v22 }
  0xf3   : > { %747 = vst.msk [vmem:[%s1180_s28 + $0x60] sm:$0xf] %vm722_vm3, %v946_v45  ;;  %v571_v56 = vmax.f32 %v471_v48, 0.0  ;;  %v587_v57 = vmax.f32 %v535_v49, 0.0  ;;  %v483_v58 = vpop.f32.mrf.mxu0  ;;  %v547_v59 = vpop.f32.mrf.mxu1 }
  0xf4   : > { %734 = vst.msk [vmem:[%s1180_s28 + $0x2c] sm:$0xf] %vm722_vm3, %v933_v52  ;;  %750 = vst.msk [vmem:[%s1180_s28 + $0x6c] sm:$0xf] %vm722_vm3, %v949_v53  ;;  %v576_v60 = vmax.f32 %v492_v54, 0.0  ;;  %v592_v61 = vmax.f32 %v556_v55, 0.0  ;;  %v484_v62 = vadd.f32 %v1169_v22, %v483_v58  ;;  %v548_v63 = vadd.f32 %v1169_v22, %v547_v59 }
  0xf5   : > { %v931_v0 = vpack.c.bf16 %v571_v56, %v571_v56  ;;  %v947_v1 = vpack.c.bf16 %v587_v57, %v587_v57  ;;  %v991_v2 = vpop.f32.mrf.mxu0  ;;  %v1007_v3 = vpop.f32.mrf.mxu1 }
  0xf6   : > { %v936_v4 = vpack.c.bf16 %v576_v60, %v576_v60  ;;  %v952_v5 = vpack.c.bf16 %v592_v61, %v592_v61  ;;  %v574_v6 = vmax.f32 %v484_v62, 0.0  ;;  %v590_v7 = vmax.f32 %v548_v63, 0.0 }
  0xf7   : > { %732 = vst.msk [vmem:[%s1180_s28 + $0x24] sm:$0xf] %vm722_vm3, %v931_v0  ;;  %748 = vst.msk [vmem:[%s1180_s28 + $0x64] sm:$0xf] %vm722_vm3, %v947_v1  ;;  %v495_v8 = vadd.f32 %v991_v2, %v1169_v22  ;;  %v559_v9 = vadd.f32 %v1007_v3, %v1169_v22  ;;  %v486_v10 = vpop.f32.mrf.mxu0  ;;  %v550_v11 = vpop.f32.mrf.mxu1 }
  0xf8   : > { %737 = vst.msk [vmem:[%s1180_s28 + $0x38] sm:$0xf] %vm722_vm3, %v936_v4  ;;  %753 = vst.msk [vmem:[%s1180_s28 + $0x78] sm:$0xf] %vm722_vm3, %v952_v5  ;;  %v934_v12 = vpack.c.bf16 %v574_v6, %v574_v6  ;;  %v950_v13 = vpack.c.bf16 %v590_v7, %v590_v7  ;;  %v487_v14 = vadd.f32 %v1169_v22, %v486_v10 }
  0xf9   : > { %v551_v15 = vadd.f32 %v1169_v22, %v550_v11  ;;  %v577_v16 = vmax.f32 %v495_v8, 0.0  ;;  %v593_v17 = vmax.f32 %v559_v9, 0.0 }
  0xfa   : > { %735 = vst.msk [vmem:[%s1180_s28 + $0x30] sm:$0xf] %vm722_vm3, %v934_v12  ;;  %751 = vst.msk [vmem:[%s1180_s28 + $0x70] sm:$0xf] %vm722_vm3, %v950_v13  ;;  %v575_v18 = vmax.f32 %v487_v14, 0.0 }
  0xfb   : > { %v591_v19 = vmax.f32 %v551_v15, 0.0  ;;  %v937_v20 = vpack.c.bf16 %v577_v16, %v577_v16  ;;  %v953_v21 = vpack.c.bf16 %v593_v17, %v593_v17 }
  0xfc   : > { %v935_v23 = vpack.c.bf16 %v575_v18, %v575_v18 }
  0xfd   : > { %v951_v24 = vpack.c.bf16 %v591_v19, %v591_v19  ;;  %738 = vst.msk [vmem:[%s1180_s28 + $0x3c] sm:$0xf] %vm722_vm3, %v937_v20  ;;  %754 = vst.msk [vmem:[%s1180_s28 + $0x7c] sm:$0xf] %vm722_vm3, %v953_v21 }
  0xfe   : > { %736 = vst.msk [vmem:[%s1180_s28 + $0x34] sm:$0xf] %vm722_vm3, %v935_v23 }
  0xff   : > { %752 = vst.msk [vmem:[%s1180_s28 + $0x74] sm:$0xf] %vm722_vm3, %v951_v24 }
 0x100 PF: > { %s13_s14 = sadd.s32 1, %s1077_s14   ;;  %s1287_s12 = smov %s1073_s13 }
 0x101   : > { %p10_p5 = scmp.ge.s32.totalorder %s13_s14, 4   ;;  %s1288_s13 = smov %s1290_s15 }
 0x103   :  { %12 = sbr.rel (!%p10_p5) target bundleno = 2 (0x2), region = 62 }

</bundles_post_ra>
